<compile_context>
chip_gen: v5e
topology: v5e:2x2
jax: 0.10.0
libtpu: 0.0.40
codegen_flags: <defaults>
</compile_context>

<pallas_src>
import functools

import jax
import jax.numpy as jnp
from jax.experimental import pallas as pl
from jax.experimental.pallas import tpu as pltpu


def _mlp_vae_kernel(in_ref, w_ref, b_ref, out_ref, *, input_dim, dmax):
    """Feature-major MLP-VAE forward for one batch tile.

    in_ref : (2*D, tb) f32   rows [0, D) = x^T (zero-padded to D features),
                             rows [D, 2D) = eps^T (zero-padded).
    w_ref  : (9, D, D) bf16  zero-padded (out, in) weights, VMEM-resident.
    b_ref  : (9, D, 1) f32   zero-padded biases (lane-broadcast over batch).
    out_ref: (I, tb)  f32    reconstruction, features on sublanes.
    """
    f32, bf16 = jnp.float32, jnp.bfloat16
    I, D = input_dim, dmax

    def dense(h, i):
        # (D, D) @ (D, tb) on the MXU with f32 accumulation; bias broadcasts
        # over the batch (lane) axis from a (D, 1) column.
        acc = jnp.dot(w_ref[i], h.astype(bf16), preferred_element_type=f32)
        return acc + b_ref[i]

    xz = in_ref[...]                 # (2D, tb) f32
    x = xz[:D, :]                    # sublane-aligned split (D % 8 == 0)
    eps = xz[D:, :]

    # ---- encode ----
    h = jnp.tanh(dense(x, 0))
    h = h + jnp.tanh(dense(h, 1))
    h = h + jnp.tanh(dense(h, 2))
    mu = dense(h, 3)                 # (D, tb): rows >= latent_dim exactly 0
    logvar = dense(h, 4)             # (D, tb): rows >= latent_dim exactly 0

    # ---- reparameterize: z = mu + eps * exp(0.5*logvar) (f32 vector path) ----
    # padded rows: 0 + 0 * exp(0) = 0, so z stays exactly zero-padded.
    z = mu + eps * jnp.exp(0.5 * logvar)

    # ---- decode ----
    h = jnp.tanh(dense(z, 5))
    h = h + jnp.tanh(dense(h, 6))
    h = h + jnp.tanh(dense(h, 7))
    y = dense(h, 8)                  # (D, tb); rows >= input_dim exactly 0

    out_ref[...] = y if I == D else y[:I, :]


def pack_params(params, input_dim, hidden_dim, latent_dim,
                weight_dtype=jnp.bfloat16):
    """Pack the 9 linear layers into one (9, D, D) weight slab + (9, D, 1) biases.

    Slot order: [l1, l2, l3, l4 (mu), l4a (logvar), l5, l6, l7, l8].
    Weights keep PyTorch's (out, in) orientation (the kernel computes W @ h)
    and are zero-padded to (D, D), D = max(input, hidden, latent) rounded up to
    the 8-sublane tile.  Zero padding is exact through every layer.
    """
    D = max(input_dim, hidden_dim, latent_dim)
    D = -(-D // 8) * 8

    def pad_w(w):  # (out, in) -> (D, D)
        return jnp.zeros((D, D), jnp.float32).at[:w.shape[0], :w.shape[1]].set(w)

    def pad_b(b):  # (out,) -> (D, 1)
        return jnp.zeros((D, 1), jnp.float32).at[:b.shape[0], 0].set(b)

    order = ["1", "2", "3", "4", "4a", "5", "6", "7", "8"]
    w_stack = jnp.stack([pad_w(params[f"W{n}"]) for n in order]).astype(weight_dtype)
    b_stack = jnp.stack([pad_b(params[f"b{n}"]) for n in order])  # f32
    return w_stack, b_stack


def mlp_vae_forward(x, eps, w_stack, b_stack, *, input_dim, block_batch=None):
    batch = x.shape[0]
    latent_dim = eps.shape[1]
    n_layers, D = w_stack.shape[0], w_stack.shape[-1]

    # Tile selection: grid iteration is a serial loop on single-TC v5e/v6e, so
    # prefer one fat step; once the batch is large enough, use 2 fat steps so
    # the "parallel" axis still shards across v7x's 2 TensorCores.
    if block_batch is None:
        n_steps = 2 if batch >= 256 else 1
    else:
        n_steps = max(1, -(-batch // block_batch))
    tb = -(-batch // (128 * n_steps)) * 128     # lanes per step, multiple of 128
    padded = tb * n_steps

    # One fused, lane-dense input slab (single DMA stream per step):
    #   rows [0, D)    = x^T   zero-padded to D feature rows
    #   rows [D, 2*D)  = eps^T zero-padded to D feature rows
    # Padded batch columns are zero and sliced off at the end.
    slab = jnp.zeros((2 * D, padded), jnp.float32)
    slab = slab.at[:input_dim, :batch].set(x.T)
    slab = slab.at[D:D + latent_dim, :batch].set(eps.T)

    kernel = functools.partial(_mlp_vae_kernel, input_dim=input_dim, dmax=D)

    flops = 2 * n_layers * D * D * padded
    transcendentals = 7 * D * padded            # 6x tanh + 1x exp per column
    bytes_accessed = (slab.size * 4
                      + w_stack.size * w_stack.dtype.itemsize
                      + b_stack.size * 4
                      + input_dim * padded * 4)

    out = pl.pallas_call(
        kernel,
        out_shape=jax.ShapeDtypeStruct((input_dim, padded), jnp.float32),
        grid=(n_steps,),
        in_specs=[
            # activations: tiled over the batch (lane) axis
            pl.BlockSpec((2 * D, tb), lambda i: (0, i)),
            # weight / bias slabs: constant index_map -> VMEM-resident, one DMA
            pl.BlockSpec((n_layers, D, D), lambda i: (0, 0, 0)),
            pl.BlockSpec((n_layers, D, 1), lambda i: (0, 0, 0)),
        ],
        out_specs=pl.BlockSpec((input_dim, tb), lambda i: (0, i)),
        compiler_params=pltpu.CompilerParams(
            dimension_semantics=("parallel",)),
        cost_estimate=pl.CostEstimate(
            flops=flops, transcendentals=transcendentals,
            bytes_accessed=bytes_accessed),
    )(slab, w_stack, b_stack)

    return out[:, :batch].T


def init_params(key, input_dim, hidden_dim, latent_dim):
    """Parameters with PyTorch-matching shapes / init.

    nn.Linear(in, out) stores weight (out, in); linears 1-8 get orthogonal
    init, linear4a keeps PyTorch's default uniform init.  Weights are kept in
    (out, in) orientation (the feature-major kernel computes W @ h).
    """
    orth = jax.nn.initializers.orthogonal()
    dims = {
        "1": (input_dim, hidden_dim),
        "2": (hidden_dim, hidden_dim),
        "3": (hidden_dim, hidden_dim),
        "4": (hidden_dim, latent_dim),
        "5": (latent_dim, hidden_dim),
        "6": (hidden_dim, hidden_dim),
        "7": (hidden_dim, hidden_dim),
        "8": (hidden_dim, input_dim),
    }
    params = {}
    keys = jax.random.split(key, 2 * len(dims) + 2)
    ki = 0
    for name, (fan_in, fan_out) in dims.items():
        params[f"W{name}"] = orth(keys[ki], (fan_out, fan_in), jnp.float32)
        ki += 1
        bound = 1.0 / (fan_in ** 0.5)
        params[f"b{name}"] = jax.random.uniform(
            keys[ki], (fan_out,), jnp.float32, -bound, bound)
        ki += 1
    # linear4a (logvar head): PyTorch default (uniform) init for weight + bias.
    fan_in, fan_out = hidden_dim, latent_dim
    bound = 1.0 / (fan_in ** 0.5)
    params["W4a"] = jax.random.uniform(
        keys[ki], (fan_out, fan_in), jnp.float32, -bound, bound)
    ki += 1
    params["b4a"] = jax.random.uniform(
        keys[ki], (fan_out,), jnp.float32, -bound, bound)
    return params


if __name__ == "__main__":
    batch = 256            # -> 2 fat grid steps of 128 lanes each
    input_dim = 32
    hidden_dim = 32
    latent_dim = 16

    root = jax.random.PRNGKey(0)
    k_param, k_x, k_eps = jax.random.split(root, 3)

    params = init_params(k_param, input_dim, hidden_dim, latent_dim)
    w_stack, b_stack = pack_params(params, input_dim, hidden_dim, latent_dim)

    x = jax.random.normal(k_x, (batch, input_dim), jnp.float32)
    # eps for the reparameterization trick (torch.randn_like equivalent),
    # drawn deterministically outside the kernel.
    eps = jax.random.normal(k_eps, (batch, latent_dim), jnp.float32)

    fwd = jax.jit(functools.partial(mlp_vae_forward, input_dim=input_dim))
    x_hat = fwd(x, eps, w_stack, b_stack)
    jax.block_until_ready(x_hat)

    # pure-JAX reference of the same math (bf16 weights / bf16 matmul inputs,
    # f32 accumulation + f32 elementwise path), batch-major.
    def ref(x, eps, p):
        bf16 = jnp.bfloat16

        def dense(h, n):
            w = p[f"W{n}"].astype(bf16)                       # (out, in)
            return (jnp.dot(h.astype(bf16), w.T,
                            preferred_element_type=jnp.float32) + p[f"b{n}"])

        h = jnp.tanh(dense(x, "1"))
        h = h + jnp.tanh(dense(h, "2"))
        h = h + jnp.tanh(dense(h, "3"))
        mu, logvar = dense(h, "4"), dense(h, "4a")
        z = mu + eps * jnp.exp(0.5 * logvar)
        h = jnp.tanh(dense(z, "5"))
        h = h + jnp.tanh(dense(h, "6"))
        h = h + jnp.tanh(dense(h, "7"))
        return dense(h, "8")

    r = ref(x, eps, params)
    assert x_hat.shape == (batch, input_dim), x_hat.shape
    err = float(jnp.max(jnp.abs(x_hat - r)))
    assert err < 2e-2, f"max abs error vs reference: {err}"

    print("KERNEL_OK")
</pallas_src>

<mosaic_0001>
module attributes {stable_mosaic.version = 11 : i64} {
  func.func @_mlp_vae_kernel(%arg0: i32, %arg1: memref<64x128xf32, #tpu.memory_space<vmem>>, %arg2: memref<9x32x32xbf16, #tpu.memory_space<vmem>>, %arg3: memref<9x32x1xf32, #tpu.memory_space<vmem>>, %arg4: memref<32x128xf32, #tpu.memory_space<vmem>>) attributes {dimension_semantics = [#tpu.dimension_semantics<parallel>], iteration_bounds = array<i64: 2>, scalar_prefetch = 0 : i64, scratch_operands = 0 : i64, tpu.core_type = #tpu.core_type<tc>, window_params = [{transform_indices = @transform_0, window_bounds = array<i64: 64, 128>}, {pipeline_mode = #tpu.pipeline_mode<synchronous>, transform_indices = @transform_1, window_bounds = array<i64: 9, 32, 32>}, {pipeline_mode = #tpu.pipeline_mode<synchronous>, transform_indices = @transform_2, window_bounds = array<i64: 9, 32, 1>}, {transform_indices = @transform_3, window_bounds = array<i64: 32, 128>}]} {
    %c0 = arith.constant 0 : index
    %c0_0 = arith.constant 0 : index
    %0 = vector.load %arg1[%c0, %c0_0] : memref<64x128xf32, #tpu.memory_space<vmem>>, vector<64x128xf32>
    %1 = vector.extract_strided_slice %0 {offsets = [0, 0], sizes = [32, 128], strides = [1, 1]} : vector<64x128xf32> to vector<32x128xf32>
    %2 = vector.extract_strided_slice %0 {offsets = [32, 0], sizes = [32, 128], strides = [1, 1]} : vector<64x128xf32> to vector<32x128xf32>
    %c0_1 = arith.constant 0 : index
    %c0_2 = arith.constant 0 : index
    %c0_3 = arith.constant 0 : index
    %3 = vector.load %arg2[%c0_1, %c0_2, %c0_3] : memref<9x32x32xbf16, #tpu.memory_space<vmem>>, vector<1x32x32xbf16>
    %4 = vector.shape_cast %3 : vector<1x32x32xbf16> to vector<32x32xbf16>
    %5 = arith.truncf %1 : vector<32x128xf32> to vector<32x128xbf16>
    %cst = arith.constant dense<0.000000e+00> : vector<32x128xf32>
    %6 = tpu.matmul %4, %5, %cst {dimension_numbers = #tpu.dot_dimension_numbers<[1], [0], [0], [1], [0, 0, 1, 1], [], []>} : vector<32x32xbf16>, vector<32x128xbf16>, vector<32x128xf32> -> vector<32x128xf32>
    %c0_4 = arith.constant 0 : index
    %c0_5 = arith.constant 0 : index
    %c0_6 = arith.constant 0 : index
    %7 = vector.load %arg3[%c0_4, %c0_5, %c0_6] : memref<9x32x1xf32, #tpu.memory_space<vmem>>, vector<1x32x1xf32>
    %8 = vector.shape_cast %7 : vector<1x32x1xf32> to vector<32x1xf32>
    %9 = vector.broadcast %8 : vector<32x1xf32> to vector<32x128xf32>
    %10 = arith.addf %6, %9 : vector<32x128xf32>
    %11 = math.tanh %10 : vector<32x128xf32>
    %c1 = arith.constant 1 : index
    %c0_7 = arith.constant 0 : index
    %c0_8 = arith.constant 0 : index
    %12 = vector.load %arg2[%c1, %c0_7, %c0_8] : memref<9x32x32xbf16, #tpu.memory_space<vmem>>, vector<1x32x32xbf16>
    %13 = vector.shape_cast %12 : vector<1x32x32xbf16> to vector<32x32xbf16>
    %14 = arith.truncf %11 : vector<32x128xf32> to vector<32x128xbf16>
    %cst_9 = arith.constant dense<0.000000e+00> : vector<32x128xf32>
    %15 = tpu.matmul %13, %14, %cst_9 {dimension_numbers = #tpu.dot_dimension_numbers<[1], [0], [0], [1], [0, 0, 1, 1], [], []>} : vector<32x32xbf16>, vector<32x128xbf16>, vector<32x128xf32> -> vector<32x128xf32>
    %c1_10 = arith.constant 1 : index
    %c0_11 = arith.constant 0 : index
    %c0_12 = arith.constant 0 : index
    %16 = vector.load %arg3[%c1_10, %c0_11, %c0_12] : memref<9x32x1xf32, #tpu.memory_space<vmem>>, vector<1x32x1xf32>
    %17 = vector.shape_cast %16 : vector<1x32x1xf32> to vector<32x1xf32>
    %18 = vector.broadcast %17 : vector<32x1xf32> to vector<32x128xf32>
    %19 = arith.addf %15, %18 : vector<32x128xf32>
    %20 = math.tanh %19 : vector<32x128xf32>
    %21 = arith.addf %11, %20 : vector<32x128xf32>
    %c2 = arith.constant 2 : index
    %c0_13 = arith.constant 0 : index
    %c0_14 = arith.constant 0 : index
    %22 = vector.load %arg2[%c2, %c0_13, %c0_14] : memref<9x32x32xbf16, #tpu.memory_space<vmem>>, vector<1x32x32xbf16>
    %23 = vector.shape_cast %22 : vector<1x32x32xbf16> to vector<32x32xbf16>
    %24 = arith.truncf %21 : vector<32x128xf32> to vector<32x128xbf16>
    %cst_15 = arith.constant dense<0.000000e+00> : vector<32x128xf32>
    %25 = tpu.matmul %23, %24, %cst_15 {dimension_numbers = #tpu.dot_dimension_numbers<[1], [0], [0], [1], [0, 0, 1, 1], [], []>} : vector<32x32xbf16>, vector<32x128xbf16>, vector<32x128xf32> -> vector<32x128xf32>
    %c2_16 = arith.constant 2 : index
    %c0_17 = arith.constant 0 : index
    %c0_18 = arith.constant 0 : index
    %26 = vector.load %arg3[%c2_16, %c0_17, %c0_18] : memref<9x32x1xf32, #tpu.memory_space<vmem>>, vector<1x32x1xf32>
    %27 = vector.shape_cast %26 : vector<1x32x1xf32> to vector<32x1xf32>
    %28 = vector.broadcast %27 : vector<32x1xf32> to vector<32x128xf32>
    %29 = arith.addf %25, %28 : vector<32x128xf32>
    %30 = math.tanh %29 : vector<32x128xf32>
    %31 = arith.addf %21, %30 : vector<32x128xf32>
    %c3 = arith.constant 3 : index
    %c0_19 = arith.constant 0 : index
    %c0_20 = arith.constant 0 : index
    %32 = vector.load %arg2[%c3, %c0_19, %c0_20] : memref<9x32x32xbf16, #tpu.memory_space<vmem>>, vector<1x32x32xbf16>
    %33 = vector.shape_cast %32 : vector<1x32x32xbf16> to vector<32x32xbf16>
    %34 = arith.truncf %31 : vector<32x128xf32> to vector<32x128xbf16>
    %cst_21 = arith.constant dense<0.000000e+00> : vector<32x128xf32>
    %35 = tpu.matmul %33, %34, %cst_21 {dimension_numbers = #tpu.dot_dimension_numbers<[1], [0], [0], [1], [0, 0, 1, 1], [], []>} : vector<32x32xbf16>, vector<32x128xbf16>, vector<32x128xf32> -> vector<32x128xf32>
    %c3_22 = arith.constant 3 : index
    %c0_23 = arith.constant 0 : index
    %c0_24 = arith.constant 0 : index
    %36 = vector.load %arg3[%c3_22, %c0_23, %c0_24] : memref<9x32x1xf32, #tpu.memory_space<vmem>>, vector<1x32x1xf32>
    %37 = vector.shape_cast %36 : vector<1x32x1xf32> to vector<32x1xf32>
    %38 = vector.broadcast %37 : vector<32x1xf32> to vector<32x128xf32>
    %39 = arith.addf %35, %38 : vector<32x128xf32>
    %c4 = arith.constant 4 : index
    %c0_25 = arith.constant 0 : index
    %c0_26 = arith.constant 0 : index
    %40 = vector.load %arg2[%c4, %c0_25, %c0_26] : memref<9x32x32xbf16, #tpu.memory_space<vmem>>, vector<1x32x32xbf16>
    %41 = vector.shape_cast %40 : vector<1x32x32xbf16> to vector<32x32xbf16>
    %42 = arith.truncf %31 : vector<32x128xf32> to vector<32x128xbf16>
    %cst_27 = arith.constant dense<0.000000e+00> : vector<32x128xf32>
    %43 = tpu.matmul %41, %42, %cst_27 {dimension_numbers = #tpu.dot_dimension_numbers<[1], [0], [0], [1], [0, 0, 1, 1], [], []>} : vector<32x32xbf16>, vector<32x128xbf16>, vector<32x128xf32> -> vector<32x128xf32>
    %c4_28 = arith.constant 4 : index
    %c0_29 = arith.constant 0 : index
    %c0_30 = arith.constant 0 : index
    %44 = vector.load %arg3[%c4_28, %c0_29, %c0_30] : memref<9x32x1xf32, #tpu.memory_space<vmem>>, vector<1x32x1xf32>
    %45 = vector.shape_cast %44 : vector<1x32x1xf32> to vector<32x1xf32>
    %46 = vector.broadcast %45 : vector<32x1xf32> to vector<32x128xf32>
    %47 = arith.addf %43, %46 : vector<32x128xf32>
    %cst_31 = arith.constant 5.000000e-01 : f32
    %48 = vector.broadcast %cst_31 : f32 to vector<32x128xf32>
    %49 = arith.mulf %48, %47 : vector<32x128xf32>
    %50 = math.exp %49 : vector<32x128xf32>
    %51 = arith.mulf %2, %50 : vector<32x128xf32>
    %52 = arith.addf %39, %51 : vector<32x128xf32>
    %c5 = arith.constant 5 : index
    %c0_32 = arith.constant 0 : index
    %c0_33 = arith.constant 0 : index
    %53 = vector.load %arg2[%c5, %c0_32, %c0_33] : memref<9x32x32xbf16, #tpu.memory_space<vmem>>, vector<1x32x32xbf16>
    %54 = vector.shape_cast %53 : vector<1x32x32xbf16> to vector<32x32xbf16>
    %55 = arith.truncf %52 : vector<32x128xf32> to vector<32x128xbf16>
    %cst_34 = arith.constant dense<0.000000e+00> : vector<32x128xf32>
    %56 = tpu.matmul %54, %55, %cst_34 {dimension_numbers = #tpu.dot_dimension_numbers<[1], [0], [0], [1], [0, 0, 1, 1], [], []>} : vector<32x32xbf16>, vector<32x128xbf16>, vector<32x128xf32> -> vector<32x128xf32>
    %c5_35 = arith.constant 5 : index
    %c0_36 = arith.constant 0 : index
    %c0_37 = arith.constant 0 : index
    %57 = vector.load %arg3[%c5_35, %c0_36, %c0_37] : memref<9x32x1xf32, #tpu.memory_space<vmem>>, vector<1x32x1xf32>
    %58 = vector.shape_cast %57 : vector<1x32x1xf32> to vector<32x1xf32>
    %59 = vector.broadcast %58 : vector<32x1xf32> to vector<32x128xf32>
    %60 = arith.addf %56, %59 : vector<32x128xf32>
    %61 = math.tanh %60 : vector<32x128xf32>
    %c6 = arith.constant 6 : index
    %c0_38 = arith.constant 0 : index
    %c0_39 = arith.constant 0 : index
    %62 = vector.load %arg2[%c6, %c0_38, %c0_39] : memref<9x32x32xbf16, #tpu.memory_space<vmem>>, vector<1x32x32xbf16>
    %63 = vector.shape_cast %62 : vector<1x32x32xbf16> to vector<32x32xbf16>
    %64 = arith.truncf %61 : vector<32x128xf32> to vector<32x128xbf16>
    %cst_40 = arith.constant dense<0.000000e+00> : vector<32x128xf32>
    %65 = tpu.matmul %63, %64, %cst_40 {dimension_numbers = #tpu.dot_dimension_numbers<[1], [0], [0], [1], [0, 0, 1, 1], [], []>} : vector<32x32xbf16>, vector<32x128xbf16>, vector<32x128xf32> -> vector<32x128xf32>
    %c6_41 = arith.constant 6 : index
    %c0_42 = arith.constant 0 : index
    %c0_43 = arith.constant 0 : index
    %66 = vector.load %arg3[%c6_41, %c0_42, %c0_43] : memref<9x32x1xf32, #tpu.memory_space<vmem>>, vector<1x32x1xf32>
    %67 = vector.shape_cast %66 : vector<1x32x1xf32> to vector<32x1xf32>
    %68 = vector.broadcast %67 : vector<32x1xf32> to vector<32x128xf32>
    %69 = arith.addf %65, %68 : vector<32x128xf32>
    %70 = math.tanh %69 : vector<32x128xf32>
    %71 = arith.addf %61, %70 : vector<32x128xf32>
    %c7 = arith.constant 7 : index
    %c0_44 = arith.constant 0 : index
    %c0_45 = arith.constant 0 : index
    %72 = vector.load %arg2[%c7, %c0_44, %c0_45] : memref<9x32x32xbf16, #tpu.memory_space<vmem>>, vector<1x32x32xbf16>
    %73 = vector.shape_cast %72 : vector<1x32x32xbf16> to vector<32x32xbf16>
    %74 = arith.truncf %71 : vector<32x128xf32> to vector<32x128xbf16>
    %cst_46 = arith.constant dense<0.000000e+00> : vector<32x128xf32>
    %75 = tpu.matmul %73, %74, %cst_46 {dimension_numbers = #tpu.dot_dimension_numbers<[1], [0], [0], [1], [0, 0, 1, 1], [], []>} : vector<32x32xbf16>, vector<32x128xbf16>, vector<32x128xf32> -> vector<32x128xf32>
    %c7_47 = arith.constant 7 : index
    %c0_48 = arith.constant 0 : index
    %c0_49 = arith.constant 0 : index
    %76 = vector.load %arg3[%c7_47, %c0_48, %c0_49] : memref<9x32x1xf32, #tpu.memory_space<vmem>>, vector<1x32x1xf32>
    %77 = vector.shape_cast %76 : vector<1x32x1xf32> to vector<32x1xf32>
    %78 = vector.broadcast %77 : vector<32x1xf32> to vector<32x128xf32>
    %79 = arith.addf %75, %78 : vector<32x128xf32>
    %80 = math.tanh %79 : vector<32x128xf32>
    %81 = arith.addf %71, %80 : vector<32x128xf32>
    %c8 = arith.constant 8 : index
    %c0_50 = arith.constant 0 : index
    %c0_51 = arith.constant 0 : index
    %82 = vector.load %arg2[%c8, %c0_50, %c0_51] : memref<9x32x32xbf16, #tpu.memory_space<vmem>>, vector<1x32x32xbf16>
    %83 = vector.shape_cast %82 : vector<1x32x32xbf16> to vector<32x32xbf16>
    %84 = arith.truncf %81 : vector<32x128xf32> to vector<32x128xbf16>
    %cst_52 = arith.constant dense<0.000000e+00> : vector<32x128xf32>
    %85 = tpu.matmul %83, %84, %cst_52 {dimension_numbers = #tpu.dot_dimension_numbers<[1], [0], [0], [1], [0, 0, 1, 1], [], []>} : vector<32x32xbf16>, vector<32x128xbf16>, vector<32x128xf32> -> vector<32x128xf32>
    %c8_53 = arith.constant 8 : index
    %c0_54 = arith.constant 0 : index
    %c0_55 = arith.constant 0 : index
    %86 = vector.load %arg3[%c8_53, %c0_54, %c0_55] : memref<9x32x1xf32, #tpu.memory_space<vmem>>, vector<1x32x1xf32>
    %87 = vector.shape_cast %86 : vector<1x32x1xf32> to vector<32x1xf32>
    %88 = vector.broadcast %87 : vector<32x1xf32> to vector<32x128xf32>
    %89 = arith.addf %85, %88 : vector<32x128xf32>
    %c0_56 = arith.constant 0 : index
    %c0_57 = arith.constant 0 : index
    %90 = vector.load %arg4[%c0_56, %c0_57] : memref<32x128xf32, #tpu.memory_space<vmem>>, vector<32x128xf32>
    tpu.vector_store %arg4[%c0_56, %c0_57], %89 {strides = array<i32>} : memref<32x128xf32, #tpu.memory_space<vmem>>, vector<32x128xf32>,
    return
  }
  func.func @transform_0(%arg0: i32) -> (i32, i32) {
    %c0_i32 = arith.constant 0 : i32
    %c0_i32_0 = arith.constant 0 : i32
    return %c0_i32, %arg0 : i32, i32
  }
  func.func @transform_1(%arg0: i32) -> (i32, i32, i32) {
    %c0_i32 = arith.constant 0 : i32
    %c0_i32_0 = arith.constant 0 : i32
    %c0_i32_1 = arith.constant 0 : i32
    %c0_i32_2 = arith.constant 0 : i32
    return %c0_i32, %c0_i32_0, %c0_i32_1 : i32, i32, i32
  }
  func.func @transform_2(%arg0: i32) -> (i32, i32, i32) {
    %c0_i32 = arith.constant 0 : i32
    %c0_i32_0 = arith.constant 0 : i32
    %c0_i32_1 = arith.constant 0 : i32
    %c0_i32_2 = arith.constant 0 : i32
    return %c0_i32, %c0_i32_0, %c0_i32_1 : i32, i32, i32
  }
  func.func @transform_3(%arg0: i32) -> (i32, i32) {
    %c0_i32 = arith.constant 0 : i32
    %c0_i32_0 = arith.constant 0 : i32
    return %c0_i32, %arg0 : i32, i32
  }
}

</mosaic_0001>

<bundles_post_ra>
// kernel: mlp_vae_forward.1
= control target key start
LH: loop header
LB: loop body
LE: loop exit
PB: predicated region body
PF: predicated region fallthrough
CT: control target
= control target key end

     0   :  { %8 = vsyncpa [#allocation4], 0  ;;  %s1649_s0 = inlined_call_operand.vmem [shape: f32[64,256], index: 0, kind: input, shape index: {}]   ;;  %s1650_s1 = inlined_call_operand.vmem [shape: bf16[9,32,32], index: 1, kind: input, shape index: {}]   ;;  %s1651_s2 = inlined_call_operand.vmem [shape: f32[9,32,1], index: 2, kind: input, shape index: {}]   ;;  %s1652_s3 = inlined_call_operand.hbm [shape: f32[32,256], index: 3, kind: output, shape index: {}]  }
   0x1   :  { %10 = vsyncpa [#allocation4 + $0x1], 0  ;;  %s1364_s12 = smov 0   ;;  %s1366_s13 = smov 0  }
   0x2   :  { %s1368_s14 = smov 0   ;;  %s1370_s15 = smov 0  }
   0x3 LB: > { %s987_s16 = sadd.s32 4294967295, %s1338_s15   ;;  %s988_s17 = sadd.s32 4294967294, %s1338_s15   ;;  %s1338_s15 = sphi %s1370_s15, %s1658_s15   ;;  %s1334_s14 = sphi %s1368_s14, %s1657_s14   ;;  %s1330_s13 = sphi %s1366_s13, %s1656_s13   ;;  %s1326_s12 = sphi %s1364_s12, %s1655_s12  }
   0x4   : > { %s1387_s18 = sadd.s32 1, %s1338_s15   ;;  %s23_s19 = sadd.s32 1, %s1334_s14 }
   0x5   : > { %s20_s20 = ssub.s32 %s1338_s15, %s1387_s18  ;;  %p30_p0 = scmp.ne.s32.totalorder %s1334_s14, %s1330_s13 }
   0x6   : > { %p21_p1 = scmp.eq.s32.totalorder %s20_s20, 0  ;;  %p31_p2 = scmp.eq.s32.totalorder %s1338_s15, 0 }
   0x7   : > { %p102_p3 = scmp.eq.s32.totalorder %s987_s16, 1  ;;  %p107_p4 = scmp.ne.s32.totalorder %s1330_s13, %s1326_s12 }
   0x8   : > { %s1400_s21 = scalar_select %p21_p1, %s1334_s14, %s23_s19  }
   0x9   : > { %p32_p5 = por %p31_p2, %p30_p0  ;;  %p1402_p6 = por %p102_p3, %p30_p0 }
   0xa   : > { %p108_p7 = scmp.eq.s32.totalorder %s988_s17, 1  ;;  %p990_p9 = scmp.ge.s32.totalorder %s1338_s15, 2 }
   0xc   : > { %p1406_p8 = por %p108_p7, %p107_p4  ;;  %130 = sbr.rel (%p990_p9) target bundleno = 29 (0x1d), region = 24 }
  0x11   : > { %133 = sbr.rel (!%p32_p5) target bundleno = 29 (0x1d), region = 28  ;;  %s135_s24 = sand.u32 (%p32_p5), 1, %s1334_s14  }
  0x12   : > { %s992_s25 = sshll.u32 (%p32_p5), %s1338_s15, 3  ;;  %s991_s26 = sshll.u32 (%p32_p5), %s135_s24, 6 }
  0x13   : > { %s139_s29 = scalar_lea.vmem (%p32_p5), %s1649_s0, %s992_s25  ;;  %s137_s30 = scalar_lea.vmem (%p32_p5), [#allocation2], %s991_s26 }
  0x14   : > { %v182_v0 = vld [vmem:[%s139_s29] sm:$0xff] (%p32_p5)  ;;  %v184_v1 = vld [vmem:[%s139_s29 + $0x10] sm:$0xff] (%p32_p5) }
  0x15   : > { %v186_v2 = vld [vmem:[%s139_s29 + $0x20] sm:$0xff] (%p32_p5)  ;;  %183 = vst [vmem:[%s137_s30] sm:$0xff] (%p32_p5), %v182_v0  ;;  %v188_v3 = vld [vmem:[%s139_s29 + $0x30] sm:$0xff] (%p32_p5) }
  0x16   : > { %185 = vst [vmem:[%s137_s30 + $0x8] sm:$0xff] %v184_v1  ;;  %v190_v4 = vld [vmem:[%s139_s29 + $0x40] sm:$0xff]  ;;  %v192_v5 = vld [vmem:[%s139_s29 + $0x50] sm:$0xff] }
  0x17   : > { %187 = vst [vmem:[%s137_s30 + $0x10] sm:$0xff] %v186_v2  ;;  %v194_v6 = vld [vmem:[%s139_s29 + $0x60] sm:$0xff]  ;;  %v196_v7 = vld [vmem:[%s139_s29 + $0x70] sm:$0xff] }
  0x18   : > { %189 = vst [vmem:[%s137_s30 + $0x18] sm:$0xff] %v188_v3 }
  0x19   : > { %191 = vst [vmem:[%s137_s30 + $0x20] sm:$0xff] %v190_v4 }
  0x1a   : > { %193 = vst [vmem:[%s137_s30 + $0x28] sm:$0xff] %v192_v5 }
  0x1b   : > { %195 = vst [vmem:[%s137_s30 + $0x30] sm:$0xff] %v194_v6 }
  0x1c   : > { %197 = vst [vmem:[%s137_s30 + $0x38] sm:$0xff] %v196_v7 }
  0x1d PF: > { %p993_p10 = scmp.ge.s32.totalorder %s1338_s15, 1  ;;  %p202_p11 = scmp.lt.s32.totalorder %s1338_s15, 3 }
  0x1f   : > { %p203_p12 = pnand %p993_p10, %p202_p11 }
  0x20   : > { %s1427_s8 = sand.u32 (!%p203_p12), 1, %s1330_s13   ;;  %s1151_s29 = sshll.u32 (!%p203_p12), %s987_s16, 3 }
  0x21   : > { %206 = sbr.rel (%p203_p12) target bundleno = 1400 (0x578), region = 66  ;;  %s994_s9 = sshll.u32 (!%p203_p12), %s1427_s8, 6 }
  0x22   : > { %s1430_s10 = scalar_lea.vmem (!%p203_p12), [#allocation2], %s994_s9  ;;  %s995_s27 = sshll.u32 (!%p203_p12), %s1427_s8, 5 }
  0x23   : > { %s231_s28 = scalar_lea.vmem (!%p203_p12), [#allocation3], %s995_s27  ;;  %s916_s4 = scalar_lea.hbm (!%p203_p12), %s1652_s3, %s1151_s29 }
  0x24   : > { %s917_s5 = sshll.u32 (!%p203_p12), %s231_s28, 4  ;;  %s919_s6 = sshll.u32 (!%p203_p12), %s916_s4, 4  ;;  %s918_s5 = int_to_ptr.vmem [resolvable:$true] %s917_s5  ;;  %s920_s6 = int_to_ptr.hbm [resolvable:$true] %s919_s6 }
  0x25   : > { %s906_s7 = scalar_lea.sflag (!%p203_p12), [#allocation4], %s1427_s8  ;;  %s1290_s9 = sshra.s32 (!%p203_p12), %s920_s6, 4  ;;  %s1291_s9 = int_to_ptr.hbm [resolvable:$true] %s1290_s9 }
  0x26   : > { %v249_v8 = vld [vmem:[%s1651_s2 + $0x10] sm:$0xff]  ;;  %v247_v9 = vld [vmem:[%s1651_s2] sm:$0xff]  ;;  %v1340_v10 = vmov 0   ;;  %v236_v12 = vld [vmem:[%s1430_s10 + $0x18] sm:$0xff]  ;;  %vm281_vm0 = vcmask 261120   ;;  %s1292_s16 = scalar_lea.hbm %s1291_s9, 32  ;;  %p1297_p2 = scmp.lt.s32.totalorder %s1291_s9, %s1652_s3 }
  0x27   : > { %1218 = vset.pattern.permute.xlu1 %v1340_v10  ;;  %1217 = vset.pattern.permute.xlu0 %v1340_v10  ;;  %v235_v11 = vld [vmem:[%s1430_s10 + $0x10] sm:$0xff]  ;;  %v233_v14 = vld [vmem:[%s1430_s10] sm:$0xff]  ;;  %v234_v15 = vld [vmem:[%s1430_s10 + $0x8] sm:$0xff]  ;;  %p1293_p13 = scmp.ne.s32.totalorder %s1291_s9, %s1292_s16  ;;  %s1296_s19 = scalar_lea.hbm %s1652_s3, 64 }
  0x28   : > { %263 = vperm.xlu0 %1217, %v249_v8   ;;  %253 = vperm.xlu1 %1218, %v247_v9   ;;  %v246_v13 = vpack.c.bf16 %v236_v12, %v235_v11  ;;  %v250_v16 = vld [vmem:[%s1651_s2 + $0x18] sm:$0xff]  ;;  %v248_v17 = vld [vmem:[%s1651_s2 + $0x8] sm:$0xff]  ;;  %v245_v18 = vpack.c.bf16 %v234_v15, %v233_v14  ;;  %v1154_v19 = vld [vmem:[%s1650_s1] sm:$0xff]  ;;  %p1298_p3 = scmp.lt.s32.totalorder %s1296_s19, %s1292_s16 }
  0x29   : > { %1219 = vset.pattern.permute.xlu2 %v1340_v10  ;;  %v1155_v20 = vld [vmem:[%s1650_s1 + $0x8] sm:$0xff]  ;;  %v1010_v21 = vld [vmem:[%s1651_s2 + $0x20] sm:$0xff]  ;;  %v1031_v23 = vld [vmem:[%s1651_s2 + $0x58] sm:$0xff]  ;;  %p1294_p0 = pnand %p1293_p13, %p1402_p6 }
  0x2a   : > { %294 = vmatpush.bf16.msra.mxu0 %v246_v13  ;;  %1172 = vmatpush.bf16.msra.mxu1 %v246_v13  ;;  %v1011_v22 = vld [vmem:[%s1651_s2 + $0x28] sm:$0xff]  ;;  %v1028_v24 = vld [vmem:[%s1651_s2 + $0x40] sm:$0xff]  ;;  %v1066_v25 = vld [vmem:[%s1651_s2 + $0x90] sm:$0xff]  ;;  %p1299_p4 = por %p1298_p3, %p1297_p2 }
  0x2b   : > { %v1067_v26 = vld [vmem:[%s1651_s2 + $0x98] sm:$0xff]  ;;  %v1065_v27 = vld [vmem:[%s1651_s2 + $0x88] sm:$0xff]  ;;  %v1048_v28 = vld [vmem:[%s1651_s2 + $0x70] sm:$0xff]  ;;  %p1295_p1 = pneg %p1294_p0 }
  0x2c   : > { %v1046_v29 = vld [vmem:[%s1651_s2 + $0x60] sm:$0xff]  ;;  %v1047_v30 = vld [vmem:[%s1651_s2 + $0x68] sm:$0xff]  ;;  %v1085_v31 = vld [vmem:[%s1651_s2 + $0xb8] sm:$0xff] }
  0x2d   : > { %v1082_v32 = vld [vmem:[%s1651_s2 + $0xa0] sm:$0xff]  ;;  %v1102_v33 = vld [vmem:[%s1651_s2 + $0xd0] sm:$0xff]  ;;  %v1103_v34 = vld [vmem:[%s1651_s2 + $0xd8] sm:$0xff]  ;;  %p1300_p5 = pnand %p1299_p4, %p1295_p1 }
  0x2e   : > { %295 = vmatpush.bf16.msra.mxu0 %v245_v18  ;;  %1173 = vmatpush.bf16.msra.mxu1 %v245_v18  ;;  %v1101_v35 = vld [vmem:[%s1651_s2 + $0xc8] sm:$0xff]  ;;  %v1120_v36 = vld [vmem:[%s1651_s2 + $0xf0] sm:$0xff]  ;;  %v1118_v37 = vld [vmem:[%s1651_s2 + $0xe0] sm:$0xff] }
  0x2f   : > { %v1119_v38 = vld [vmem:[%s1651_s2 + $0xe8] sm:$0xff]  ;;  %v1138_v40 = vld [vmem:[%s1651_s2 + $0x110] sm:$0xff]  ;;  %v1013_v42 = vld [vmem:[%s1651_s2 + $0x38] sm:$0xff] }
  0x30   : > { %268 = vperm.xlu0 %1217, %v250_v16   ;;  %258 = vperm.xlu1 %1218, %v248_v17   ;;  %v1137_v39 = vld [vmem:[%s1651_s2 + $0x108] sm:$0xff]  ;;  %v1012_v41 = vld [vmem:[%s1651_s2 + $0x30] sm:$0xff]  ;;  %v1064_v45 = vld [vmem:[%s1651_s2 + $0x80] sm:$0xff] }
  0x31   : > { %1004 = vmatmul.msk.bf16.vlgmr.msra.gmra.mxu0 %vm281_vm0, %v1154_v19  ;;  %1005 = vmatmul.msk.bf16.vlgmr.msra.gmra.mxu1 %vm281_vm0, %v1155_v20  ;;  %v1030_v43 = vld [vmem:[%s1651_s2 + $0x50] sm:$0xff]  ;;  %v1029_v44 = vld [vmem:[%s1651_s2 + $0x48] sm:$0xff]  ;;  %v1049_v46 = vld [vmem:[%s1651_s2 + $0x78] sm:$0xff] }
  0x32   : > { %335 = vperm.xlu2 %1219, %v1012_v41   ;;  %v1084_v51 = vld [vmem:[%s1651_s2 + $0xb0] sm:$0xff]  ;;  %v1083_v60 = vld [vmem:[%s1651_s2 + $0xa8] sm:$0xff]  ;;  %v1100_v0 = vld [vmem:[%s1651_s2 + $0xc0] sm:$0xff] }
  0x33   : > { %v1156_v4 = vld [vmem:[%s1650_s1 + $0x10] sm:$0xff]  ;;  %v1121_v5 = vld [vmem:[%s1651_s2 + $0xf8] sm:$0xff]  ;;  %v1136_v6 = vld [vmem:[%s1651_s2 + $0x100] sm:$0xff] }
  0x34   : > { %v1157_v7 = vld [vmem:[%s1650_s1 + $0x18] sm:$0xff] }
  0x35   : > { %v1139_v8 = vld [vmem:[%s1651_s2 + $0x118] sm:$0xff] }
  0x38   : > { %325 = vperm.xlu0 %1217, %v1010_v21   ;;  %330 = vperm.xlu1 %1218, %v1011_v22  }
  0x3a   : > { %340 = vperm.xlu2 %1219, %v1013_v42  }
  0x40   : > { %415 = vperm.xlu0 %1217, %v1031_v23   ;;  %400 = vperm.xlu1 %1218, %v1028_v24  }
  0x42   : > { %410 = vperm.xlu2 %1219, %v1030_v43  }
  0x48   : > { %550 = vperm.xlu0 %1217, %v1066_v25   ;;  %555 = vperm.xlu1 %1218, %v1067_v26  }
  0x4a   : > { %405 = vperm.xlu2 %1219, %v1029_v44  }
  0x50   : > { %545 = vperm.xlu0 %1217, %v1065_v27   ;;  %485 = vperm.xlu1 %1218, %v1048_v28  }
  0x52   : > { %540 = vperm.xlu2 %1219, %v1064_v45  }
  0x58   : > { %475 = vperm.xlu0 %1217, %v1046_v29   ;;  %480 = vperm.xlu1 %1218, %v1047_v30  }
  0x5a   : > { %490 = vperm.xlu2 %1219, %v1049_v46  }
  0x60   : > { %642 = vperm.xlu0 %1217, %v1085_v31   ;;  %627 = vperm.xlu1 %1218, %v1082_v32   ;;  %v1158_v31 = vld [vmem:[%s1650_s1 + $0x20] sm:$0xff]  ;;  %v1159_v32 = vld [vmem:[%s1650_s1 + $0x28] sm:$0xff] }
  0x62   : > { %637 = vperm.xlu2 %1219, %v1084_v51  }
  0x68   : > { %708 = vperm.xlu0 %1217, %v1102_v33   ;;  %713 = vperm.xlu1 %1218, %v1103_v34  }
  0x6a   : > { %632 = vperm.xlu2 %1219, %v1083_v60  }
  0x70   : > { %703 = vperm.xlu0 %1217, %v1101_v35   ;;  %783 = vperm.xlu1 %1218, %v1120_v36  }
  0x72   : > { %698 = vperm.xlu2 %1219, %v1100_v0  }
  0x78   : > { %773 = vperm.xlu0 %1217, %v1118_v37   ;;  %778 = vperm.xlu1 %1218, %v1119_v38  }
  0x7a   : > { %788 = vperm.xlu2 %1219, %v1121_v5  }
  0x80   : > { %853 = vperm.xlu0 %1217, %v1137_v39   ;;  %858 = vperm.xlu1 %1218, %v1138_v40  }
  0x82   : > { %848 = vperm.xlu2 %1219, %v1136_v6  }
  0x8a   : > { %863 = vperm.xlu2 %1219, %v1139_v8  }
  0x8c   : > { %v336_v11 = vpop.permute.xlu2 %335 }
  0x94   : > { %v341_v17 = vpop.permute.xlu2 %340 }
  0x9a   : > { %v264_v47 = vpop.permute.xlu0 %263  ;;  %v254_v48 = vpop.permute.xlu1 %253 }
  0x9c   : > { %v411_v35 = vpop.permute.xlu2 %410 }
  0xa2   : > { %v269_v52 = vpop.permute.xlu0 %268  ;;  %v259_v56 = vpop.permute.xlu1 %258 }
  0xa4   : > { %v406_v37 = vpop.permute.xlu2 %405 }
  0xaa   : > { %v331_v13 = vpop.permute.xlu1 %330  ;;  %v326_v16 = vpop.permute.xlu0 %325 }
  0xae   : > { %v297_v49 = vpop.f32.mrf.mxu0  ;;  %v302_v50 = vpop.f32.mrf.mxu1 }
  0xaf   : > { %v303_v53 = vadd.f32 %v302_v50, %v264_v47  ;;  %v298_v59 = vadd.f32 %v297_v49, %v254_v48 }
  0xb1   : > { %1220 = vtanh.f32 %v303_v53 }
  0xb2   : > { %v416_v40 = vpop.permute.xlu0 %415  ;;  %v401_v41 = vpop.permute.xlu1 %400 }
  0xb6   : > { %v299_v54 = vpop.f32.mrf.mxu0  ;;  %v304_v55 = vpop.f32.mrf.mxu1 }
  0xb7   : > { %v305_v57 = vadd.f32 %v304_v55, %v269_v52  ;;  %v300_v58 = vadd.f32 %v299_v54, %v259_v56  ;;  %v1221_v61 = vpop.eup %1220  ;;  %v1160_v55 = vld [vmem:[%s1650_s1 + $0x30] sm:$0xff]  ;;  %v1162_v56 = vld [vmem:[%s1650_s1 + $0x40] sm:$0xff] }
  0xb9   : > { %1222 = vtanh.f32 %v305_v57  ;;  %v1161_v57 = vld [vmem:[%s1650_s1 + $0x38] sm:$0xff] }
  0xba   : > { %1224 = vtanh.f32 %v300_v58  ;;  %v1163_v58 = vld [vmem:[%s1650_s1 + $0x48] sm:$0xff]  ;;  %v551_v60 = vpop.permute.xlu0 %550  ;;  %v556_v6 = vpop.permute.xlu1 %555 }
  0xbb   : > { %1226 = vtanh.f32 %v298_v59 }
  0xbf   : > { %v1223_v62 = vpop.eup %1222 }
  0xc0   : > { %v317_v63 = vpack.c.bf16 %v1223_v62, %v1221_v61  ;;  %v1225_v1 = vpop.eup %1224 }
  0xc1   : > { %v1227_v2 = vpop.eup %1226 }
  0xc2   : > { %365 = vmatpush.bf16.msrb.mxu1 %v317_v63  ;;  %v316_v3 = vpack.c.bf16 %v1225_v1, %v1227_v2  ;;  %v546_v0 = vpop.permute.xlu0 %545 }
  0xc6   : > { %366 = vmatpush.bf16.msrb.mxu1 %v316_v3 }
  0xc9   : > { %1022 = vmatmul.msk.bf16.vlgmr.msrb.gmra.mxu1 %vm281_vm0, %v1156_v4 }
  0xd9   : > { %1023 = vmatmul.msk.bf16.gmra.mxu1 %vm281_vm0, %v1157_v7 }
 0x146   : > { %v368_v9 = vpop.f32.mrf.mxu1 }
 0x147   : > { %v369_v19 = vadd.f32 %v368_v9, %v326_v16 }
 0x14e   : > { %v370_v10 = vpop.f32.mrf.mxu1 }
 0x14f   : > { %v371_v15 = vadd.f32 %v370_v10, %v331_v13 }
 0x156   : > { %v373_v12 = vpop.f32.mrf.mxu1 }
 0x157   : > { %v374_v14 = vadd.f32 %v373_v12, %v336_v11 }
 0x159   : > { %1228 = vtanh.f32 %v374_v14 }
 0x15a   : > { %1230 = vtanh.f32 %v371_v15 }
 0x15e   : > { %v375_v18 = vpop.f32.mrf.mxu1 }
 0x15f   : > { %v376_v20 = vadd.f32 %v375_v18, %v341_v17  ;;  %v1229_v21 = vpop.eup %1228  ;;  %v486_v17 = vpop.permute.xlu1 %485 }
 0x160   : > { %v1231_v22 = vpop.eup %1230  ;;  %v384_v24 = vadd.f32 %v1229_v21, %v1221_v61 }
 0x161   : > { %1232 = vtanh.f32 %v376_v20  ;;  %v383_v28 = vadd.f32 %v1231_v22, %v1225_v1  ;;  %v239_v20 = vld [vmem:[%s1430_s10 + $0x30] sm:$0xff]  ;;  %v238_v22 = vld [vmem:[%s1430_s10 + $0x28] sm:$0xff] }
 0x162   : > { %1234 = vtanh.f32 %v369_v19 }
 0x167   : > { %v1233_v23 = vpop.eup %1232 }
 0x168   : > { %v385_v25 = vadd.f32 %v1233_v23, %v1223_v62  ;;  %v1235_v26 = vpop.eup %1234  ;;  %v240_v23 = vld [vmem:[%s1430_s10 + $0x38] sm:$0xff] }
 0x169   : > { %v382_v29 = vadd.f32 %v1235_v26, %v1227_v2  ;;  %v541_v2 = vpop.permute.xlu2 %540 }
 0x16a   : > { %v392_v27 = vpack.c.bf16 %v385_v25, %v384_v24 }
 0x16b   : > { %v391_v30 = vpack.c.bf16 %v383_v28, %v382_v29 }
 0x16c   : > { %440 = vmatpush.bf16.msra.mxu2 %v392_v27 }
 0x170   : > { %441 = vmatpush.bf16.msra.mxu2 %v391_v30 }
 0x173   : > { %1040 = vmatmul.msk.bf16.vlgmr.msra.gmra.mxu2 %vm281_vm0, %v1158_v31 }
 0x183   : > { %1041 = vmatmul.msk.bf16.gmra.mxu2 %vm281_vm0, %v1159_v32 }
 0x1f6   : > { %v443_v33 = vpop.f32.mrf.mxu2 }
 0x1f7   : > { %v444_v43 = vadd.f32 %v443_v33, %v401_v41 }
 0x1fe   : > { %v445_v34 = vpop.f32.mrf.mxu2 }
 0x1ff   : > { %v446_v39 = vadd.f32 %v445_v34, %v406_v37  ;;  %v481_v34 = vpop.permute.xlu1 %480 }
 0x206   : > { %v448_v36 = vpop.f32.mrf.mxu2 }
 0x207   : > { %v449_v38 = vadd.f32 %v448_v36, %v411_v35 }
 0x209   : > { %1236 = vtanh.f32 %v449_v38 }
 0x20a   : > { %1238 = vtanh.f32 %v446_v39  ;;  %v476_v39 = vpop.permute.xlu0 %475 }
 0x20e   : > { %v450_v42 = vpop.f32.mrf.mxu2 }
 0x20f   : > { %v451_v44 = vadd.f32 %v450_v42, %v416_v40  ;;  %v1237_v45 = vpop.eup %1236 }
 0x210   : > { %v1239_v46 = vpop.eup %1238  ;;  %v459_v48 = vadd.f32 %v1237_v45, %v384_v24  ;;  %v1164_v45 = vld [vmem:[%s1650_s1 + $0x50] sm:$0xff] }
 0x211   : > { %1240 = vtanh.f32 %v451_v44  ;;  %v458_v52 = vadd.f32 %v1239_v46, %v383_v28  ;;  %v491_v28 = vpop.permute.xlu2 %490  ;;  %v1165_v46 = vld [vmem:[%s1650_s1 + $0x58] sm:$0xff] }
 0x212   : > { %1242 = vtanh.f32 %v444_v43 }
 0x217   : > { %v1241_v47 = vpop.eup %1240 }
 0x218   : > { %v460_v49 = vadd.f32 %v1241_v47, %v385_v25  ;;  %v1243_v50 = vpop.eup %1242 }
 0x219   : > { %v457_v53 = vadd.f32 %v1243_v50, %v382_v29  ;;  %v237_v29 = vld [vmem:[%s1430_s10 + $0x20] sm:$0xff] }
 0x21a   : > { %v467_v51 = vpack.c.bf16 %v460_v49, %v459_v48  ;;  %v638_v49 = vpop.permute.xlu2 %637 }
 0x21b   : > { %v466_v54 = vpack.c.bf16 %v458_v52, %v457_v53  ;;  %v643_v52 = vpop.permute.xlu0 %642 }
 0x21c   : > { %515 = vmatpush.bf16.msra.mxu3 %v467_v51  ;;  %580 = vmatpush.bf16.msrb.mxu0 %v467_v51 }
 0x220   : > { %516 = vmatpush.bf16.msra.mxu3 %v466_v54  ;;  %581 = vmatpush.bf16.msrb.mxu0 %v466_v54 }
 0x222   : > { %v633_v53 = vpop.permute.xlu2 %632 }
 0x223   : > { %1058 = vmatmul.msk.bf16.vlgmr.msra.gmra.mxu3 %vm281_vm0, %v1160_v55  ;;  %1076 = vmatmul.msk.bf16.vlgmr.msrb.gmra.mxu0 %vm281_vm0, %v1162_v56 }
 0x233   : > { %1059 = vmatmul.msk.bf16.gmra.mxu3 %vm281_vm0, %v1161_v57  ;;  %1077 = vmatmul.msk.bf16.gmra.mxu0 %vm281_vm0, %v1163_v58  ;;  %v628_v57 = vpop.permute.xlu1 %627 }
 0x2a0   : > { %v583_v59 = vpop.f32.mrf.mxu0 }
 0x2a1   : > { %v584_v5 = vadd.f32 %v583_v59, %v541_v2  ;;  %v1167_v2 = vld [vmem:[%s1650_s1 + $0x68] sm:$0xff] }
 0x2a3   : > { %v593_v9 = vmul.f32 0.5, %v584_v5  ;;  %v709_v5 = vpop.permute.xlu0 %708 }
 0x2a5   : > { %v597_v15 = vmul.f32 1.442695, %v593_v9 }
 0x2a6   : > { %v518_v61 = vpop.f32.mrf.mxu3 }
 0x2a7   : > { %v519_v40 = vadd.f32 %v518_v61, %v476_v39 }
 0x2a8   : > { %v585_v62 = vpop.f32.mrf.mxu0 }
 0x2a9   : > { %v586_v3 = vadd.f32 %v585_v62, %v546_v0 }
 0x2ab   : > { %v594_v8 = vmul.f32 0.5, %v586_v3 }
 0x2ad   : > { %v599_v12 = vmul.f32 1.442695, %v594_v8 }
 0x2ae   : > { %v520_v63 = vpop.f32.mrf.mxu3 }
 0x2af   : > { %v521_v36 = vadd.f32 %v520_v63, %v481_v34 }
 0x2b0   : > { %v588_v1 = vpop.f32.mrf.mxu0 }
 0x2b1   : > { %v589_v4 = vadd.f32 %v588_v1, %v551_v60  ;;  %v1166_v1 = vld [vmem:[%s1650_s1 + $0x60] sm:$0xff] }
 0x2b3   : > { %v595_v7 = vmul.f32 0.5, %v589_v4 }
 0x2b5   : > { %v601_v10 = vmul.f32 1.442695, %v595_v7  ;;  %v704_v7 = vpop.permute.xlu0 %703 }
 0x2b6   : > { %v523_v13 = vpop.f32.mrf.mxu3 }
 0x2b7   : > { %1244 = vpow2.f32 %v601_v10  ;;  %v524_v31 = vadd.f32 %v523_v13, %v486_v17  ;;  %v714_v10 = vpop.permute.xlu1 %713 }
 0x2b8   : > { %v590_v11 = vpop.f32.mrf.mxu0  ;;  %1246 = vpow2.f32 %v599_v12 }
 0x2b9   : > { %v591_v14 = vadd.f32 %v590_v11, %v556_v6  ;;  %1248 = vpow2.f32 %v597_v15  ;;  %v699_v11 = vpop.permute.xlu2 %698 }
 0x2bb   : > { %v596_v16 = vmul.f32 0.5, %v591_v14 }
 0x2bd   : > { %v603_v18 = vmul.f32 1.442695, %v596_v16  ;;  %v1245_v19 = vpop.eup %1244  ;;  %v774_v34 = vpop.permute.xlu0 %773 }
 0x2be   : > { %v1247_v21 = vpop.eup %1246  ;;  %v525_v24 = vpop.f32.mrf.mxu3  ;;  %v607_v26 = vmul.f32 %v1245_v19, %v239_v20 }
 0x2bf   : > { %1250 = vpow2.f32 %v603_v18  ;;  %v1249_v25 = vpop.eup %1248  ;;  %v606_v30 = vmul.f32 %v1247_v21, %v238_v22  ;;  %v526_v32 = vadd.f32 %v525_v24, %v491_v28 }
 0x2c0   : > { %v605_v35 = vmul.f32 %v1249_v25, %v237_v29  ;;  %v611_v37 = vadd.f32 %v607_v26, %v524_v31  ;;  %v1168_v25 = vld [vmem:[%s1650_s1 + $0x70] sm:$0xff]  ;;  %v1169_v26 = vld [vmem:[%s1650_s1 + $0x78] sm:$0xff]  ;;  %v784_v29 = vpop.permute.xlu1 %783 }
 0x2c1   : > { %v610_v41 = vadd.f32 %v606_v30, %v521_v36 }
 0x2c2   : > { %v609_v43 = vadd.f32 %v605_v35, %v519_v40  ;;  %v789_v35 = vpop.permute.xlu2 %788 }
 0x2c4   : > { %v618_v44 = vpack.c.bf16 %v610_v41, %v609_v43 }
 0x2c5   : > { %v1251_v27 = vpop.eup %1250 }
 0x2c6   : > { %v608_v33 = vmul.f32 %v1251_v27, %v240_v23 }
 0x2c8   : > { %v612_v38 = vadd.f32 %v608_v33, %v526_v32  ;;  %v779_v31 = vpop.permute.xlu1 %778 }
 0x2ca   : > { %v619_v42 = vpack.c.bf16 %v612_v38, %v611_v37 }
 0x2cc   : > { %667 = vmatpush.bf16.msra.mxu1 %v619_v42 }
 0x2d0   : > { %668 = vmatpush.bf16.msra.mxu1 %v618_v44 }
 0x2d3   : > { %1094 = vmatmul.msk.bf16.vlgmr.msra.gmra.mxu1 %vm281_vm0, %v1164_v45 }
 0x2e3   : > { %1095 = vmatmul.msk.bf16.gmra.mxu1 %vm281_vm0, %v1165_v46 }
 0x350   : > { %v670_v47 = vpop.f32.mrf.mxu1 }
 0x351   : > { %v671_v58 = vadd.f32 %v670_v47, %v628_v57  ;;  %v859_v57 = vpop.permute.xlu1 %858 }
 0x358   : > { %v672_v48 = vpop.f32.mrf.mxu1 }
 0x359   : > { %v673_v55 = vadd.f32 %v672_v48, %v633_v53 }
 0x360   : > { %v675_v50 = vpop.f32.mrf.mxu1 }
 0x361   : > { %v676_v51 = vadd.f32 %v675_v50, %v638_v49  ;;  %v1170_v49 = vld [vmem:[%s1650_s1 + $0x80] sm:$0xff]  ;;  %v1171_v50 = vld [vmem:[%s1650_s1 + $0x88] sm:$0xff] }
 0x363   : > { %1252 = vtanh.f32 %v676_v51  ;;  %v849_v51 = vpop.permute.xlu2 %848 }
 0x368   : > { %v677_v54 = vpop.f32.mrf.mxu1 }
 0x369   : > { %v678_v56 = vadd.f32 %v677_v54, %v643_v52  ;;  %v1253_v59 = vpop.eup %1252  ;;  %v854_v54 = vpop.permute.xlu0 %853 }
 0x36b   : > { %1254 = vtanh.f32 %v678_v56 }
 0x36c   : > { %1256 = vtanh.f32 %v673_v55 }
 0x36d   : > { %1258 = vtanh.f32 %v671_v58 }
 0x371   : > { %v1255_v60 = vpop.eup %1254 }
 0x372   : > { %v690_v61 = vpack.c.bf16 %v1255_v60, %v1253_v59  ;;  %v1257_v62 = vpop.eup %1256 }
 0x373   : > { %v1259_v63 = vpop.eup %1258 }
 0x374   : > { %738 = vmatpush.bf16.msrb.mxu2 %v690_v61  ;;  %v689_v0 = vpack.c.bf16 %v1257_v62, %v1259_v63 }
 0x378   : > { %739 = vmatpush.bf16.msrb.mxu2 %v689_v0 }
 0x37b   : > { %1112 = vmatmul.msk.bf16.vlgmr.msrb.gmra.mxu2 %vm281_vm0, %v1166_v1 }
 0x38b   : > { %1113 = vmatmul.msk.bf16.gmra.mxu2 %vm281_vm0, %v1167_v2 }
 0x3fe   : > { %v741_v3 = vpop.f32.mrf.mxu2 }
 0x3ff   : > { %v742_v13 = vadd.f32 %v741_v3, %v699_v11 }
 0x406   : > { %v743_v4 = vpop.f32.mrf.mxu2 }
 0x407   : > { %v744_v9 = vadd.f32 %v743_v4, %v704_v7 }
 0x40e   : > { %v746_v6 = vpop.f32.mrf.mxu2 }
 0x40f   : > { %v747_v8 = vadd.f32 %v746_v6, %v709_v5 }
 0x411   : > { %1260 = vtanh.f32 %v747_v8 }
 0x412   : > { %1262 = vtanh.f32 %v744_v9 }
 0x416   : > { %v748_v12 = vpop.f32.mrf.mxu2 }
 0x417   : > { %v749_v14 = vadd.f32 %v748_v12, %v714_v10  ;;  %v1261_v15 = vpop.eup %1260 }
 0x418   : > { %v1263_v16 = vpop.eup %1262  ;;  %v757_v18 = vadd.f32 %v1261_v15, %v1253_v59 }
 0x419   : > { %1264 = vtanh.f32 %v749_v14  ;;  %v756_v22 = vadd.f32 %v1263_v16, %v1257_v62 }
 0x41a   : > { %1266 = vtanh.f32 %v742_v13 }
 0x41f   : > { %v1265_v17 = vpop.eup %1264 }
 0x420   : > { %v758_v19 = vadd.f32 %v1265_v17, %v1255_v60  ;;  %v1267_v20 = vpop.eup %1266  ;;  %v864_v60 = vpop.permute.xlu2 %863 }
 0x421   : > { %v755_v23 = vadd.f32 %v1267_v20, %v1259_v63 }
 0x422   : > { %v765_v21 = vpack.c.bf16 %v758_v19, %v757_v18 }
 0x423   : > { %v764_v24 = vpack.c.bf16 %v756_v22, %v755_v23 }
 0x424   : > { %813 = vmatpush.bf16.msrb.mxu3 %v765_v21 }
 0x428   : > { %814 = vmatpush.bf16.msrb.mxu3 %v764_v24 }
 0x42b   : > { %1130 = vmatmul.msk.bf16.vlgmr.msrb.gmra.mxu3 %vm281_vm0, %v1168_v25 }
 0x43b   : > { %1131 = vmatmul.msk.bf16.gmra.mxu3 %vm281_vm0, %v1169_v26 }
 0x4ae   : > { %v816_v27 = vpop.f32.mrf.mxu3 }
 0x4af   : > { %v817_v37 = vadd.f32 %v816_v27, %v774_v34 }
 0x4b6   : > { %v818_v28 = vpop.f32.mrf.mxu3 }
 0x4b7   : > { %v819_v33 = vadd.f32 %v818_v28, %v779_v31 }
 0x4be   : > { %v821_v30 = vpop.f32.mrf.mxu3 }
 0x4bf   : > { %v822_v32 = vadd.f32 %v821_v30, %v784_v29 }
 0x4c1   : > { %1268 = vtanh.f32 %v822_v32 }
 0x4c2   : > { %1270 = vtanh.f32 %v819_v33 }
 0x4c6   : > { %v823_v36 = vpop.f32.mrf.mxu3 }
 0x4c7   : > { %v824_v38 = vadd.f32 %v823_v36, %v789_v35  ;;  %v1269_v39 = vpop.eup %1268 }
 0x4c8   : > { %v1271_v40 = vpop.eup %1270  ;;  %v832_v42 = vadd.f32 %v1269_v39, %v757_v18 }
 0x4c9   : > { %1272 = vtanh.f32 %v824_v38  ;;  %v831_v46 = vadd.f32 %v1271_v40, %v756_v22 }
 0x4ca   : > { %1274 = vtanh.f32 %v817_v37 }
 0x4cf   : > { %v1273_v41 = vpop.eup %1272 }
 0x4d0   : > { %v833_v43 = vadd.f32 %v1273_v41, %v758_v19  ;;  %v1275_v44 = vpop.eup %1274 }
 0x4d1   : > { %v830_v47 = vadd.f32 %v1275_v44, %v755_v23 }
 0x4d2   : > { %v840_v45 = vpack.c.bf16 %v833_v43, %v832_v42 }
 0x4d3   : > { %v839_v48 = vpack.c.bf16 %v831_v46, %v830_v47 }
 0x4d4   : > { %888 = vmatpush.bf16.msra.mxu0 %v840_v45 }
 0x4d8   : > { %889 = vmatpush.bf16.msra.mxu0 %v839_v48 }
 0x4db   : > { %1148 = vmatmul.msk.bf16.vlgmr.msra.gmra.mxu0 %vm281_vm0, %v1170_v49 }
 0x4eb   : > { %1149 = vmatmul.msk.bf16.gmra.mxu0 %vm281_vm0, %v1171_v50 }
 0x558   : > { %v891_v52 = vpop.f32.mrf.mxu0 }
 0x559   : > { %v892_v53 = vadd.f32 %v891_v52, %v849_v51 }
 0x55b   : > { %901 = vst [vmem:[%s231_s28] sm:$0xff] %v892_v53 }
 0x560   : > { %v893_v55 = vpop.f32.mrf.mxu0 }
 0x561   : > { %v894_v56 = vadd.f32 %v893_v55, %v854_v54 }
 0x563   : > { %902 = vst [vmem:[%s231_s28 + $0x8] sm:$0xff] %v894_v56 }
 0x568   : > { %v896_v58 = vpop.f32.mrf.mxu0 }
 0x569   : > { %v897_v59 = vadd.f32 %v896_v58, %v859_v57 }
 0x56b   : > { %903 = vst [vmem:[%s231_s28 + $0x10] sm:$0xff] %v897_v59 }
 0x570   : > { %v898_v61 = vpop.f32.mrf.mxu0 }
 0x571   : > { %v899_v62 = vadd.f32 %v898_v61, %v864_v60 }
 0x573   : > { %904 = vst [vmem:[%s231_s28 + $0x18] sm:$0xff] %v899_v62 }
 0x574   : > { %1303 = shalt.err (!%p1300_p5)
}
 0x575   : > { %s1341_s8 = smov 128   ;;  %s1342_s25 = smov 256  }
 0x576   : > { %s1343_s26 = smov 8  }
 0x577   : > { %1174 = dma.vmem_to_hbm [thread:$0]  (%p1402_p6), %s918_s5, 512, %s920_s6, %s906_s7, %s1341_s8, %s1342_s25, %s1343_s26  }
 0x578 PF: > { %s934_s27 = sand.u32 1, %s1326_s12   ;;  %p1177_p7 = pnand %p990_p9, %p1406_p8 }
 0x579   : > { %s935_s28 = scalar_lea.sflag [#allocation4], %s934_s27 }
 0x57a   : > { %p1178_p10 = pneg %p1177_p7 }
 0x57c   : > { %1321 = dma.done.wait (%p1178_p10), %s935_s28, 512  }
 0x57d   : > { %1323 = vsyncadd (%p1178_p10), %s935_s28, 4294966784  ;;  %p13_p11 = scmp.ge.s32.totalorder %s1387_s18, 4   ;;  %s1655_s12 = smov %s1330_s13 }
 0x57e   : > { %s1656_s13 = smov %s1334_s14  ;;  %s1657_s14 = smov %s1400_s21 }
 0x57f   : > { %s1658_s15 = smov %s1387_s18  ;;  %15 = sbr.rel (!%p13_p11) target bundleno = 3 (0x3), region = 126 }
 0x584   :  { %941 = vsyncpa [#allocation4], 1 }
 0x585   :  { %943 = vsyncpa [#allocation4 + $0x1], 1 }

</bundles_post_ra>
